<compile_context>
chip_gen: v6e
topology: v6e:2x2x1
jax: 0.10.0
libtpu: 0.0.40
codegen_flags: <defaults>
</compile_context>

<pallas_src>
import functools

import jax
import jax.numpy as jnp
from jax.experimental import pallas as pl
from jax.experimental.pallas import tpu as pltpu


def _round_up(n, m):
    return ((n + m - 1) // m) * m


def _pick_tile(dim, candidates):
    for c in candidates:
        if dim % c == 0:
            return c
    return candidates[-1]


# ----------------------------------------------------------------------------
# Fused kernel: y = LeakyReLU(x @ W + b, neg_slope), K-tiled with f32 acc.
# ----------------------------------------------------------------------------
def _fclayer_kernel(x_ref, w_ref, b_ref, o_ref, acc_ref, *, neg_slope):
    k = pl.program_id(2)

    @pl.when(k == 0)
    def _():
        acc_ref[...] = jnp.zeros_like(acc_ref)

    # bf16 x bf16 -> f32 accumulate on the MXU.
    acc_ref[...] += jnp.dot(x_ref[...], w_ref[...],
                            preferred_element_type=jnp.float32)

    @pl.when(k == pl.num_programs(2) - 1)
    def _():
        y = acc_ref[...] + b_ref[...]            # (1, bn) broadcasts over rows
        y = jnp.where(y > 0, y, neg_slope * y)   # f32 epilogue (v5e-safe)
        o_ref[...] = y.astype(o_ref.dtype)


# ----------------------------------------------------------------------------
# Parameters: PyTorch nn.Linear default-like init, stored padded + transposed.
# ----------------------------------------------------------------------------
def init_fclayer_params(key, innodes, nodes):
    kp = _round_up(innodes, 128)            # padded in-features  (lane/128)
    np_ = _round_up(nodes, 128)             # padded out-features (lane/128)
    bk = _pick_tile(kp, (512, 256, 128))    # K tile
    bn = _pick_tile(np_, (256, 128))        # N tile

    kw, kb = jax.random.split(key)
    bound = 1.0 / (innodes ** 0.5)
    # PyTorch weight is (out, in); store transposed (in, out) so kernel is x @ W.
    w = jax.random.uniform(kw, (nodes, innodes), jnp.float32,
                           minval=-bound, maxval=bound).T
    b = jax.random.uniform(kb, (nodes,), jnp.float32,
                           minval=-bound, maxval=bound)

    w_pad = jnp.zeros((kp, np_), jnp.float32).at[:innodes, :nodes].set(w)
    b_pad = jnp.zeros((1, np_), jnp.float32).at[0, :nodes].set(b)
    return {
        "w": w_pad.astype(jnp.bfloat16),    # zero padding stays exactly zero
        "b": b_pad,
        "innodes": innodes,
        "nodes": nodes,
        "kp": kp,
        "np": np_,
        "bk": bk,
        "bn": bn,
    }


# ----------------------------------------------------------------------------
# Forward wrapper
# ----------------------------------------------------------------------------
def fclayer_forward(params, x, *, neg_slope=0.2, out_dtype=jnp.float32):
    B, fin = x.shape
    assert fin == params["innodes"], (fin, params["innodes"])
    kp, np_ = params["kp"], params["np"]
    bk, bn = params["bk"], params["bn"]

    bp = _round_up(max(B, 1), 16)                       # bf16 sublane tiling
    bm = _pick_tile(bp, (256, 128, 64, 32, 16))         # M tile

    # Cast (and pad only if misaligned) the activations to bf16 in the wrapper.
    if B == bp and fin == kp:
        x_in = x.astype(jnp.bfloat16)
    else:
        x_in = jnp.zeros((bp, kp), jnp.bfloat16).at[:B, :fin].set(
            x.astype(jnp.bfloat16))

    grid = (bp // bm, np_ // bn, kp // bk)

    cost = pl.CostEstimate(
        flops=2 * bp * kp * np_,
        transcendentals=0,
        bytes_accessed=bp * kp * 2 + kp * np_ * 2 + np_ * 4 + bp * np_ * 4,
    )

    kernel = functools.partial(_fclayer_kernel, neg_slope=neg_slope)
    out_pad = pl.pallas_call(
        kernel,
        out_shape=jax.ShapeDtypeStruct((bp, np_), out_dtype),
        grid_spec=pltpu.PrefetchScalarGridSpec(
            num_scalar_prefetch=0,
            grid=grid,
            in_specs=[
                pl.BlockSpec((bm, bk), lambda i, j, k: (i, k)),   # x tile
                pl.BlockSpec((bk, bn), lambda i, j, k: (k, j)),   # W tile
                pl.BlockSpec((1, bn), lambda i, j, k: (0, j)),    # bias tile
            ],
            out_specs=pl.BlockSpec((bm, bn), lambda i, j, k: (i, j)),
            scratch_shapes=[pltpu.VMEM((bm, bn), jnp.float32)],
        ),
        compiler_params=pltpu.CompilerParams(
            dimension_semantics=("parallel", "parallel", "arbitrary"),
            vmem_limit_bytes=32 * 1024 * 1024,
        ),
        cost_estimate=cost,
    )(x_in, params["w"], params["b"])

    if B == bp and params["nodes"] == np_:
        return out_pad
    return out_pad[:B, :params["nodes"]]


# Pure-JAX reference (same bf16-input / f32-accumulate math path).
def fclayer_ref(params, x, *, neg_slope=0.2):
    w = params["w"][:params["innodes"], :params["nodes"]]  # bf16 (in, out)
    b = params["b"][0, :params["nodes"]]
    y = jnp.dot(x.astype(jnp.bfloat16), w,
                preferred_element_type=jnp.float32) + b
    return jnp.where(y > 0, y, neg_slope * y)


# ----------------------------------------------------------------------------
if __name__ == "__main__":
    key = jax.random.PRNGKey(0)
    kx, kp_ = jax.random.split(key)

    batch, innodes, nodes = 4, 16, 32
    x = jax.random.normal(kx, (batch, innodes), dtype=jnp.float32)
    params = init_fclayer_params(kp_, innodes, nodes)

    out = fclayer_forward(params, x)
    out = jax.block_until_ready(out)

    ref = fclayer_ref(params, x)
    assert out.shape == (batch, nodes), out.shape
    assert jnp.allclose(out, ref, atol=1e-3, rtol=1e-3), (out, ref)

    print("KERNEL_OK")
</pallas_src>

<mosaic_0001>
module attributes {stable_mosaic.version = 11 : i64} {
  func.func @_fclayer_kernel(%arg0: i32, %arg1: i32, %arg2: i32, %arg3: memref<16x128xbf16, #tpu.memory_space<vmem>>, %arg4: memref<128x128xbf16, #tpu.memory_space<vmem>>, %arg5: memref<1x128xf32, #tpu.memory_space<vmem>>, %arg6: memref<16x128xf32, #tpu.memory_space<vmem>>, %arg7: memref<16x128xf32, #tpu.memory_space<vmem>>) attributes {dimension_semantics = [#tpu.dimension_semantics<parallel>, #tpu.dimension_semantics<parallel>, #tpu.dimension_semantics<arbitrary>], iteration_bounds = array<i64: 1, 1, 1>, scalar_prefetch = 0 : i64, scratch_operands = 1 : i64, tpu.core_type = #tpu.core_type<tc>, window_params = [{transform_indices = @transform_0, window_bounds = array<i64: 16, 128>}, {transform_indices = @transform_1, window_bounds = array<i64: 128, 128>}, {transform_indices = @transform_2, window_bounds = array<i64: 1, 128>}, {transform_indices = @transform_3, window_bounds = array<i64: 16, 128>}]} {
    %c0_i32 = arith.constant 0 : i32
    %0 = arith.cmpi eq, %arg2, %c0_i32 : i32
    %1 = arith.extui %0 : i1 to i32
    %c0_i32_0 = arith.constant 0 : i32
    %2 = arith.cmpi ne, %1, %c0_i32_0 : i32
    scf.if %2 {
      %cst_10 = arith.constant 0.000000e+00 : f32
      %12 = vector.broadcast %cst_10 : f32 to vector<16x128xf32>
      %c0_11 = arith.constant 0 : index
      %c0_12 = arith.constant 0 : index
      %13 = vector.load %arg7[%c0_11, %c0_12] : memref<16x128xf32, #tpu.memory_space<vmem>>, vector<16x128xf32>
      tpu.vector_store %arg7[%c0_11, %c0_12], %12 {strides = array<i32>} : memref<16x128xf32, #tpu.memory_space<vmem>>, vector<16x128xf32>,
    } else {
    }
    %c0 = arith.constant 0 : index
    %c0_1 = arith.constant 0 : index
    %3 = vector.load %arg7[%c0, %c0_1] : memref<16x128xf32, #tpu.memory_space<vmem>>, vector<16x128xf32>
    %c0_2 = arith.constant 0 : index
    %c0_3 = arith.constant 0 : index
    %4 = vector.load %arg3[%c0_2, %c0_3] : memref<16x128xbf16, #tpu.memory_space<vmem>>, vector<16x128xbf16>
    %c0_4 = arith.constant 0 : index
    %c0_5 = arith.constant 0 : index
    %5 = vector.load %arg4[%c0_4, %c0_5] : memref<128x128xbf16, #tpu.memory_space<vmem>>, vector<128x128xbf16>
    %cst = arith.constant dense<0.000000e+00> : vector<16x128xf32>
    %6 = tpu.matmul %4, %5, %cst {dimension_numbers = #tpu.dot_dimension_numbers<[1], [0], [0], [1], [0, 0, 1, 1], [], []>} : vector<16x128xbf16>, vector<128x128xbf16>, vector<16x128xf32> -> vector<16x128xf32>
    %7 = arith.addf %3, %6 : vector<16x128xf32>
    %c0_6 = arith.constant 0 : index
    %c0_7 = arith.constant 0 : index
    %8 = vector.load %arg7[%c0_6, %c0_7] : memref<16x128xf32, #tpu.memory_space<vmem>>, vector<16x128xf32>
    tpu.vector_store %arg7[%c0_6, %c0_7], %7 {strides = array<i32>} : memref<16x128xf32, #tpu.memory_space<vmem>>, vector<16x128xf32>,
    %c0_i32_8 = arith.constant 0 : i32
    %9 = arith.cmpi eq, %arg2, %c0_i32_8 : i32
    %10 = arith.extui %9 : i1 to i32
    %c0_i32_9 = arith.constant 0 : i32
    %11 = arith.cmpi ne, %10, %c0_i32_9 : i32
    scf.if %11 {
      %c0_10 = arith.constant 0 : index
      %c0_11 = arith.constant 0 : index
      %12 = vector.load %arg7[%c0_10, %c0_11] : memref<16x128xf32, #tpu.memory_space<vmem>>, vector<16x128xf32>
      %c0_12 = arith.constant 0 : index
      %c0_13 = arith.constant 0 : index
      %13 = vector.load %arg5[%c0_12, %c0_13] : memref<1x128xf32, #tpu.memory_space<vmem>>, vector<1x128xf32>
      %14 = vector.broadcast %13 : vector<1x128xf32> to vector<16x128xf32>
      %15 = arith.addf %12, %14 : vector<16x128xf32>
      %cst_14 = arith.constant 0.000000e+00 : f32
      %16 = vector.broadcast %cst_14 : f32 to vector<16x128xf32>
      %17 = arith.cmpf ogt, %15, %16 : vector<16x128xf32>
      %cst_15 = arith.constant 2.000000e-01 : f32
      %18 = vector.broadcast %cst_15 : f32 to vector<16x128xf32>
      %19 = arith.mulf %18, %15 : vector<16x128xf32>
      %20 = arith.select %17, %15, %19 : vector<16x128xi1>, vector<16x128xf32>
      %c0_16 = arith.constant 0 : index
      %c0_17 = arith.constant 0 : index
      %21 = vector.load %arg6[%c0_16, %c0_17] : memref<16x128xf32, #tpu.memory_space<vmem>>, vector<16x128xf32>
      tpu.vector_store %arg6[%c0_16, %c0_17], %20 {strides = array<i32>} : memref<16x128xf32, #tpu.memory_space<vmem>>, vector<16x128xf32>,
    } else {
    }
    return
  }
  func.func @transform_0(%arg0: i32, %arg1: i32, %arg2: i32) -> (i32, i32) {
    %c0_i32 = arith.constant 0 : i32
    return %arg0, %arg2 : i32, i32
  }
  func.func @transform_1(%arg0: i32, %arg1: i32, %arg2: i32) -> (i32, i32) {
    %c0_i32 = arith.constant 0 : i32
    return %arg2, %arg1 : i32, i32
  }
  func.func @transform_2(%arg0: i32, %arg1: i32, %arg2: i32) -> (i32, i32) {
    %c0_i32 = arith.constant 0 : i32
    %c0_i32_0 = arith.constant 0 : i32
    return %c0_i32, %arg1 : i32, i32
  }
  func.func @transform_3(%arg0: i32, %arg1: i32, %arg2: i32) -> (i32, i32) {
    %c0_i32 = arith.constant 0 : i32
    return %arg0, %arg1 : i32, i32
  }
}

</mosaic_0001>

<bundles_post_ra>
// kernel: tpu_custom_call.1
= control target key start
LH: loop header
LB: loop body
LE: loop exit
PB: predicated region body
PF: predicated region fallthrough
CT: control target
= control target key end

     0   :  { %8 = vsyncpa [#allocation4], 0  ;;  %s373_s0 = inlined_call_operand.hbm [shape: bf16[16,128], index: 0, kind: input, shape index: {}]   ;;  %s374_s1 = inlined_call_operand.hbm [shape: bf16[128,128], index: 1, kind: input, shape index: {}]   ;;  %s375_s2 = inlined_call_operand.vmem [shape: f32[1,128], index: 2, kind: input, shape index: {}]   ;;  %s376_s3 = inlined_call_operand.hbm [shape: f32[16,128], index: 3, kind: output, shape index: {}]  }
   0x1   :  { %9 = vsyncpa [#allocation7], 0 }
   0x2   :  { %10 = vsyncpa [#allocation5], 0  ;;  %s332_s12 = smov [#allocation3]  }
   0x3   :  { %s16_s13 = sshll.u32 %s332_s12, 4  ;;  %s17_s13 = int_to_ptr.vmem [resolvable:$true] %s16_s13 }
   0x4   :  { %s274_s14 = scalar_lea.vmem %s17_s13, 128  ;;  %p279_p1 = scmp.lt.s32.totalorder %s17_s13, %s17_s13 }
   0x5   :  { %p275_p0 = scmp.ne.s32.totalorder %s17_s13, %s274_s14  ;;  %p280_p2 = scmp.lt.s32.totalorder %s274_s14, %s274_s14 }
   0x7   :  { %p281_p3 = por %p280_p2, %p279_p1 }
   0x9   :  { %p282_p4 = pnand %p281_p3, %p275_p0 }
   0xb   :  { %285 = shalt.err (!%p282_p4)
}
   0xc   :  { %s333_s15 = smov 64   ;;  %s334_s16 = smov 4  }
   0xd   :  { %22 = dma.hbm_to_vmem [thread:$0]  %s373_s0, 128, %s17_s13, [#allocation4], %s333_s15, %s333_s15, %s334_s16  }
   0xe   :  { %s335_s19 = smov [#allocation6]  }
   0xf   :  { %s28_s20 = sshll.u32 %s335_s19, 4  ;;  %s29_s20 = int_to_ptr.vmem [resolvable:$true] %s28_s20 }
  0x10   :  { %s294_s21 = scalar_lea.vmem %s29_s20, 1024  ;;  %p299_p6 = scmp.lt.s32.totalorder %s29_s20, %s29_s20 }
  0x11   :  { %p295_p5 = scmp.ne.s32.totalorder %s29_s20, %s294_s21  ;;  %p300_p7 = scmp.lt.s32.totalorder %s294_s21, %s294_s21 }
  0x13   :  { %p301_p8 = por %p300_p7, %p299_p6 }
  0x15   :  { %p302_p9 = pnand %p301_p8, %p295_p5 }
  0x17   :  { %305 = shalt.err (!%p302_p9)
}
  0x18   :  { %34 = dma.hbm_to_vmem [thread:$0]  %s374_s1, 1024, %s29_s20, [#allocation7], %s333_s15, %s333_s15, %s334_s16  }
  0x19   :  { %326 = dma.done.wait [#allocation4], 128  }
  0x1a   :  { %327 = vsyncadd [#allocation4], 4294967168 }
  0x1b   :  { %328 = dma.done.wait [#allocation7], 1024  }
  0x1c   :  { %329 = vsyncadd [#allocation7], 4294966272  ;;  %v336_v0 = vmov 0.0   ;;  %vm337_vm0 = vmmov 0   ;;  %v257_v1 = vld [vmem:[#allocation6 + $0x38] sm:$0xff]   ;;  %v258_v2 = vld [vmem:[#allocation6 + $0x30] sm:$0xff]  }
  0x1d   :  { %228 = vmatprep.subr.bf16.mxu0 %v336_v0  ;;  %244 = vmatprep.mubr.msk.bf16.mxu0 %vm337_vm0, %v336_v0  ;;  %v259_v3 = vld [vmem:[#allocation6 + $0x28] sm:$0xff]   ;;  %v260_v4 = vld [vmem:[#allocation6 + $0x20] sm:$0xff]   ;;  %v261_v5 = vld [vmem:[#allocation6 + $0x18] sm:$0xff]   ;;  %s338_s24 = smov [#allocation8]  }
  0x1e   :  { %229 = vmatpush3.bf16.msra.mxu0 %v257_v1  ;;  %v262_v6 = vld [vmem:[#allocation6 + $0x10] sm:$0xff]   ;;  %v263_v7 = vld [vmem:[#allocation6 + $0x8] sm:$0xff]   ;;  %v264_v8 = vld [vmem:[#allocation6] sm:$0xff]   ;;  %s196_s25 = sshll.u32 %s338_s24, 4  ;;  %s197_s25 = int_to_ptr.vmem [resolvable:$true] %s196_s25 }
  0x1f   :  { %230 = vmatprep.subr.bf16.mxu0 %v336_v0  ;;  %v265_v9 = vld [vmem:[#allocation3] sm:$0xff]   ;;  %s306_s26 = scalar_lea.vmem %s197_s25, 256  ;;  %p311_p11 = scmp.lt.s32.totalorder %s197_s25, %s197_s25 }
  0x20   :  { %v218_v10 = vld [vmem:[%s375_s2] ss:$0 sm:$0xff]  ;;  %p307_p10 = scmp.ne.s32.totalorder %s197_s25, %s306_s26  ;;  %p312_p12 = scmp.lt.s32.totalorder %s306_s26, %s306_s26 }
  0x22   :  { %231 = vmatpush3.bf16.msra.mxu0 %v258_v2  ;;  %p313_p13 = por %p312_p12, %p311_p11 }
  0x23   :  { %232 = vmatprep.subr.bf16.mxu0 %v336_v0 }
  0x24   :  { %p314_p0 = pnand %p313_p13, %p307_p10 }
  0x26   :  { %233 = vmatpush3.bf16.msra.mxu0 %v259_v3 }
  0x27   :  { %234 = vmatprep.subr.bf16.mxu0 %v336_v0 }
  0x2a   :  { %235 = vmatpush3.bf16.msra.mxu0 %v260_v4 }
  0x2b   :  { %236 = vmatprep.subr.bf16.mxu0 %v336_v0 }
  0x2e   :  { %237 = vmatpush3.bf16.msra.mxu0 %v261_v5 }
  0x2f   :  { %238 = vmatprep.subr.bf16.mxu0 %v336_v0 }
  0x32   :  { %239 = vmatpush3.bf16.msra.mxu0 %v262_v6 }
  0x33   :  { %240 = vmatprep.subr.bf16.mxu0 %v336_v0 }
  0x36   :  { %241 = vmatpush3.bf16.msra.mxu0 %v263_v7 }
  0x37   :  { %242 = vmatprep.subr.bf16.mxu0 %v336_v0 }
  0x3a   :  { %243 = vmatpush3.bf16.msra.mxu0 %v264_v8 }
  0x3d   :  { %245 = vmatmul.mubr.bf16.vlgmr.msra.gmra.mxu0 %v265_v9 }
  0xfd   :  { %v158_v11 = vpop.f32.mrf.mxu0 }
  0xfe   :  { %v181_v12 = vadd.f32 %v218_v10, %v158_v11 }
  0xff   :  { %v246_v13 = vpop.f32.mrf.mxu0 }
 0x100   :  { %vm183_vm1 = vcmp.gt.f32.partialorder %v181_v12, 0.0  ;;  %v185_v14 = vmul.f32 0.2, %v181_v12 }
 0x101   :  { %v161_v15 = vpop.f32.mrf.mxu0 }
 0x102   :  { %v187_v16 = vsel %vm183_vm1, %v181_v12, %v185_v14  ;;  %v182_v17 = vadd.f32 %v218_v10, %v161_v15 }
 0x103   :  { %189 = vst [vmem:[#allocation8] sm:$0xff] %v187_v16  ;;  %v247_v18 = vpop.f32.mrf.mxu0 }
 0x104   :  { %vm184_vm2 = vcmp.gt.f32.partialorder %v182_v17, 0.0  ;;  %v186_v19 = vmul.f32 0.2, %v182_v17 }
 0x106   :  { %v188_v20 = vsel %vm184_vm2, %v182_v17, %v186_v19 }
 0x107   :  { %190 = vst [vmem:[#allocation8 + $0x8] sm:$0xff] %v188_v20 }
 0x108   :  { %317 = shalt.err (!%p314_p0)
}
 0x109   :  { %s339_s2 = smov 128   ;;  %s340_s27 = smov 8  }
 0x10a   :  { %202 = dma.vmem_to_hbm [thread:$0]  %s197_s25, 256, %s376_s3, [#allocation5], %s339_s2, %s339_s2, %s340_s27  }
 0x10b   :  { %330 = dma.done.wait [#allocation5], 256  }
 0x10c   :  { %331 = vsyncadd [#allocation5], 4294967040 }
 0x10d   :  { %206 = vsyncpa [#allocation4], 1 }
 0x10e   :  { %207 = vsyncpa [#allocation7], 1 }
 0x10f   :  { %208 = vsyncpa [#allocation5], 1 }

</bundles_post_ra>
